<compile_context>
chip_gen: v7x
topology: tpu7x:2x2x1
jax: 0.10.0
libtpu: 0.0.40
codegen_flags: <defaults>
</compile_context>

<pallas_src>
import jax
import jax.numpy as jnp
import numpy as np
from jax import lax
from jax.experimental import pallas as pl
from jax.experimental.pallas import tpu as pltpu


def _round_up(x, m):
    return ((x + m - 1) // m) * m


# ---------------------------------------------------------------------------
# Kernel 1: two-step message passing over the 2E (two-way edge) axis.
# grid = (phase, edge_tile):
#   phase 0: agg[n]    += sum of two-way edge attrs with indeg == n   (scatter_add)
#   phase 1: summed[n] += sum over edges e with indeg==n of agg[outdeg[e]]
# Output of this call is `summed` (un-normalized); scatter_mean + MLP happen in
# the node-tiled second call.
# ---------------------------------------------------------------------------
def _scatter_kernel(indeg_ref, outdeg_ref, edge2_ref, sum_ref, agg_acc, agg_bf):
    p = pl.program_id(0)          # phase: 0 = scatter_add edges, 1 = gather + scatter_add
    k = pl.program_id(1)          # edge tile index
    n_nodes = agg_acc.shape[0]    # padded node count
    te = edge2_ref.shape[0]       # edge tile size

    indeg = indeg_ref[...]                                       # [1, TE] int32
    # Per-tile one-hot "scatter onto node" matrix (0/1 — exact in bf16).
    oh_in = (lax.broadcasted_iota(jnp.int32, (n_nodes, te), 0)
             == indeg).astype(jnp.bfloat16)                      # [N, TE]

    @pl.when(jnp.logical_and(p == 0, k == 0))
    def _():
        agg_acc[...] = jnp.zeros_like(agg_acc)
        sum_ref[...] = jnp.zeros_like(sum_ref)

    @pl.when(p == 0)
    def _():
        # scatter_add(twoway_edge_attr, indeg); edges already bf16 from wrapper,
        # accumulation stays f32 on the MXU.
        agg_acc[...] += jnp.dot(oh_in, edge2_ref[...],
                                preferred_element_type=jnp.float32)

    @pl.when(jnp.logical_and(p == 1, k == 0))
    def _():
        # One-shot cast of agg for all phase-1 gather matmuls.
        agg_bf[...] = agg_acc[...].astype(jnp.bfloat16)

    @pl.when(p == 1)
    def _():
        outdeg = outdeg_ref[...]                                  # [TE, 1] int32
        oh_out = (lax.broadcasted_iota(jnp.int32, (te, n_nodes), 1)
                  == outdeg).astype(jnp.bfloat16)                 # [TE, N]
        gathered = jnp.dot(oh_out, agg_bf[...],
                           preferred_element_type=jnp.float32)    # [TE, Fh]
        # scatter_add the gathered neighbour aggregates back onto the indeg node,
        # accumulating directly into the resident output block.
        sum_ref[...] += jnp.dot(oh_in, gathered.astype(jnp.bfloat16),
                                preferred_element_type=jnp.float32)


# ---------------------------------------------------------------------------
# Kernel 2: node-tiled scatter_mean + fused MLP (Linear->ReLU->Linear) + LayerNorm.
# ---------------------------------------------------------------------------
def make_mlp_kernel(fout, eps=1e-5):
    """fout = number of *real* output features (LayerNorm normalizes over these)."""

    def kernel(sum_ref, invc_ref, node_ref, w1a_ref, w1b_ref, b1_ref,
               w2_ref, b2_ref, g_ref, be_ref, out_ref):
        # scatter_mean: divide by precomputed in-degree count (reciprocal from wrapper)
        avg = sum_ref[...] * invc_ref[...]                        # [TN, Fh]

        # Split-w1 form avoids the lane-axis concat of (avg, node_attr).
        h = (jnp.dot(avg, w1a_ref[...], preferred_element_type=jnp.float32)
             + jnp.dot(node_ref[...], w1b_ref[...], preferred_element_type=jnp.float32)
             + b1_ref[...])
        h = jnp.maximum(h, 0.0)
        y = jnp.dot(h, w2_ref[...], preferred_element_type=jnp.float32) + b2_ref[...]

        # Centered two-pass LayerNorm over the real `fout` lanes only.  Padded
        # lanes of y are exactly 0 (zero-padded w2 columns / b2), so the plain
        # lane sum of y equals the sum over real lanes; the variance uses a
        # lane mask so padded lanes do not contribute (y - mean) terms.
        fp = y.shape[-1]
        lane = lax.broadcasted_iota(jnp.int32, (1, fp), 1)
        mask = (lane < fout).astype(jnp.float32)
        mean = jnp.sum(y, axis=-1, keepdims=True) * (1.0 / fout)
        yc = (y - mean) * mask
        var = jnp.sum(yc * yc, axis=-1, keepdims=True) * (1.0 / fout)
        # padded lanes of gamma/beta are 0, so padded output lanes stay 0.
        out_ref[...] = yc * lax.rsqrt(var + eps) * g_ref[...] + be_ref[...]

    return kernel


def node_block_forward(node_attr, edge_attr, edge_index, params, *,
                       edge_tile=128, node_tile=128):
    """Builds two-way connectivity / padded operands, then runs the two kernels.

    edge_tile: 128 (v5e native MXU K); use 256 on v6e/v7x for large graphs.
    node_tile: node rows per MLP grid step (raise to 512-2048 on v7x).
    """
    N, Fn = node_attr.shape
    E, F2 = edge_attr.shape
    Fh = F2 // 2
    w1, b1, w2, b2, gamma, beta = params
    H = w1.shape[1]
    Fout = w2.shape[1]

    # ---- two-way message-passing connectivity (same as the PyTorch module) ----
    senders = edge_index[0].astype(jnp.int32)
    receivers = edge_index[1].astype(jnp.int32)
    indeg = jnp.concatenate([senders, receivers], axis=0)                     # [2E]
    outdeg = jnp.concatenate([receivers, senders], axis=0)                    # [2E]
    twoway = jnp.concatenate([edge_attr[:, :Fh], edge_attr[:, Fh:]], axis=0)  # [2E, Fh]

    # Precompute the scatter_mean denominator (reciprocal) in the wrapper.
    count = jnp.zeros((N,), jnp.float32).at[indeg].add(1.0)
    inv_count = (1.0 / jnp.maximum(count, 1.0)).reshape(N, 1)

    # ---- pad the edge axis to a multiple of the edge tile; pre-cast to bf16 ----
    twoE = 2 * E
    twoE_pad = _round_up(max(twoE, edge_tile), edge_tile)
    pad_e = twoE_pad - twoE
    indeg_p = jnp.pad(indeg, (0, pad_e), constant_values=-1).reshape(1, twoE_pad)
    outdeg_p = jnp.pad(outdeg, (0, pad_e), constant_values=0).reshape(twoE_pad, 1)
    twoway_bf = jnp.pad(twoway.astype(jnp.bfloat16), ((0, pad_e), (0, 0)))

    # ---- pad node axis to a multiple of the node tile ----
    NP = _round_up(max(N, node_tile), node_tile)
    node_p = jnp.pad(node_attr, ((0, NP - N), (0, 0)))
    invc_p = jnp.pad(inv_count, ((0, NP - N), (0, 0)), constant_values=1.0)

    # ---- split w1 (avg/node halves) and zero-pad MLP dims to 128 lanes ----
    HP = _round_up(H, 128)
    FP = _round_up(Fout, 128)
    w1a = jnp.pad(w1[:Fh], ((0, 0), (0, HP - H)))            # [Fh, HP]
    w1b = jnp.pad(w1[Fh:], ((0, 0), (0, HP - H)))            # [Fn, HP]
    b1p = jnp.pad(b1, (0, HP - H)).reshape(1, HP)
    w2p = jnp.pad(w2, ((0, HP - H), (0, FP - Fout)))         # [HP, FP]
    b2p = jnp.pad(b2, (0, FP - Fout)).reshape(1, FP)
    gp = jnp.pad(gamma, (0, FP - Fout)).reshape(1, FP)
    bp = jnp.pad(beta, (0, FP - Fout)).reshape(1, FP)

    kt = twoE_pad // edge_tile

    # ---------------- call 1: message passing (scatter / gather / scatter) ----
    summed = pl.pallas_call(
        _scatter_kernel,
        out_shape=jax.ShapeDtypeStruct((NP, Fh), jnp.float32),
        grid_spec=pltpu.PrefetchScalarGridSpec(
            num_scalar_prefetch=0,
            grid=(2, kt),                                     # (phase, edge tiles)
            in_specs=[
                # indeg: needed in both phases -> streams with k.
                pl.BlockSpec((1, edge_tile), lambda p, k: (0, k)),
                # outdeg: only read in phase 1 -> pin to block 0 during phase 0.
                pl.BlockSpec((edge_tile, 1), lambda p, k: (k * p, 0)),
                # edge attrs: only read in phase 0 -> pin to block 0 during phase 1.
                pl.BlockSpec((edge_tile, Fh), lambda p, k: (k * (1 - p), 0)),
            ],
            out_specs=pl.BlockSpec((NP, Fh), lambda p, k: (0, 0)),
            scratch_shapes=[pltpu.VMEM((NP, Fh), jnp.float32),     # agg (f32 acc)
                            pltpu.VMEM((NP, Fh), jnp.bfloat16)],   # agg (bf16, cast once)
        ),
        compiler_params=pltpu.CompilerParams(
            dimension_semantics=("arbitrary", "arbitrary"),
            vmem_limit_bytes=32 * 1024 * 1024,   # safe on v7x's 64 MiB physical VMEM
        ),
    )(indeg_p, outdeg_p, twoway_bf)

    # ---------------- call 2: node-tiled scatter_mean + MLP + LayerNorm ----
    mlp_kernel = make_mlp_kernel(fout=Fout)
    out_padded = pl.pallas_call(
        mlp_kernel,
        out_shape=jax.ShapeDtypeStruct((NP, FP), jnp.float32),
        grid=(NP // node_tile,),
        in_specs=[
            pl.BlockSpec((node_tile, Fh), lambda i: (i, 0)),   # summed messages
            pl.BlockSpec((node_tile, 1), lambda i: (i, 0)),    # 1 / in-degree count
            pl.BlockSpec((node_tile, Fn), lambda i: (i, 0)),   # node_attr
            pl.BlockSpec((Fh, HP), lambda i: (0, 0)),          # w1 (avg half)
            pl.BlockSpec((Fn, HP), lambda i: (0, 0)),          # w1 (node half)
            pl.BlockSpec((1, HP), lambda i: (0, 0)),           # b1
            pl.BlockSpec((HP, FP), lambda i: (0, 0)),          # w2
            pl.BlockSpec((1, FP), lambda i: (0, 0)),           # b2
            pl.BlockSpec((1, FP), lambda i: (0, 0)),           # gamma
            pl.BlockSpec((1, FP), lambda i: (0, 0)),           # beta
        ],
        out_specs=pl.BlockSpec((node_tile, FP), lambda i: (i, 0)),
        compiler_params=pltpu.CompilerParams(
            dimension_semantics=("parallel",),                 # megacore-shardable
            vmem_limit_bytes=32 * 1024 * 1024,
        ),
    )(summed, invc_p, node_p, w1a, w1b, b1p, w2p, b2p, gp, bp)

    return out_padded[:N, :Fout]


def node_block_reference(node_attr, edge_attr, edge_index, params):
    """Plain-JAX f32 reference reproducing the PyTorch semantics."""
    N, Fn = node_attr.shape
    E, F2 = edge_attr.shape
    Fh = F2 // 2
    senders, receivers = edge_index[0], edge_index[1]
    indeg = jnp.concatenate([senders, receivers], axis=0)
    outdeg = jnp.concatenate([receivers, senders], axis=0)
    twoway = jnp.concatenate([edge_attr[:, :Fh], edge_attr[:, Fh:]], axis=0)

    agg = jnp.zeros((N, Fh), jnp.float32).at[indeg].add(twoway)
    gathered = agg[outdeg]
    summed = jnp.zeros((N, Fh), jnp.float32).at[indeg].add(gathered)
    count = jnp.zeros((N,), jnp.float32).at[indeg].add(1.0)
    avg = summed / jnp.maximum(count, 1.0)[:, None]

    w1, b1, w2, b2, gamma, beta = params
    x = jnp.concatenate([avg, node_attr], axis=1)
    h = jnp.maximum(x @ w1 + b1, 0.0)
    y = h @ w2 + b2
    mean = jnp.mean(y, axis=-1, keepdims=True)
    var = jnp.mean((y - mean) ** 2, axis=-1, keepdims=True)
    return (y - mean) * lax.rsqrt(var + 1e-5) * gamma + beta


if __name__ == "__main__":
    # Small, deterministic problem (3 edge tiles at TE=128 so the grid really iterates).
    N, E = 64, 192         # nodes, edges  -> 2E = 384 two-way edges
    Fn = 8                 # node feature size
    Fh = 8                 # per-direction edge feature size (edge_attr has 2*Fh)
    H = 32                 # MLP hidden size
    Fout = 8               # MLP output size
    input_size = Fh + Fn   # what the original module's `input_size` refers to

    key = jax.random.PRNGKey(0)
    k = jax.random.split(key, 9)

    node_attr = jax.random.normal(k[0], (N, Fn), jnp.float32)
    edge_attr = jax.random.normal(k[1], (E, 2 * Fh), jnp.float32)
    edge_index = jax.random.randint(k[2], (2, E), 0, N, jnp.int32)

    # Deterministic parameter init for custom_func (2-layer MLP + LayerNorm).
    w1 = jax.random.normal(k[3], (input_size, H), jnp.float32) * 0.1
    b1 = jax.random.normal(k[4], (H,), jnp.float32) * 0.01
    w2 = jax.random.normal(k[5], (H, Fout), jnp.float32) * 0.1
    b2 = jax.random.normal(k[6], (Fout,), jnp.float32) * 0.01
    gamma = jnp.ones((Fout,), jnp.float32)
    beta = jnp.zeros((Fout,), jnp.float32)
    params = (w1, b1, w2, b2, gamma, beta)

    out = node_block_forward(node_attr, edge_attr, edge_index, params)
    out = jax.block_until_ready(out)

    ref = node_block_reference(node_attr, edge_attr, edge_index, params)
    # bf16 streamed edges / one-hots / agg operand on the MXU introduce ~1e-3
    # absolute differences vs the pure-f32 reference; tolerance reflects that.
    np.testing.assert_allclose(np.asarray(out), np.asarray(ref),
                               rtol=2e-2, atol=2e-2)

    print("KERNEL_OK")
</pallas_src>

<mosaic_0001>
module attributes {stable_mosaic.version = 11 : i64} {
  func.func @_scatter_kernel(%arg0: i32, %arg1: i32, %arg2: memref<1x128xi32, #tpu.memory_space<vmem>>, %arg3: memref<128x1xi32, #tpu.memory_space<vmem>>, %arg4: memref<128x8xbf16, #tpu.memory_space<vmem>>, %arg5: memref<128x8xf32, #tpu.memory_space<vmem>>, %arg6: memref<128x8xf32, #tpu.memory_space<vmem>>, %arg7: memref<128x8xbf16, #tpu.memory_space<vmem>>) attributes {dimension_semantics = [#tpu.dimension_semantics<arbitrary>, #tpu.dimension_semantics<arbitrary>], iteration_bounds = array<i64: 2, 3>, scalar_prefetch = 0 : i64, scratch_operands = 2 : i64, tpu.core_type = #tpu.core_type<tc>, window_params = [{transform_indices = @transform_0, window_bounds = array<i64: 1, 128>}, {transform_indices = @transform_1, window_bounds = array<i64: 128, 1>}, {transform_indices = @transform_2, window_bounds = array<i64: 128, 8>}, {pipeline_mode = #tpu.pipeline_mode<synchronous>, transform_indices = @transform_3, window_bounds = array<i64: 128, 8>}]} {
    %c0 = arith.constant 0 : index
    %c0_0 = arith.constant 0 : index
    %0 = vector.load %arg2[%c0, %c0_0] : memref<1x128xi32, #tpu.memory_space<vmem>>, vector<1x128xi32>
    %1 = tpu.iota {dimensions = array<i32: 0>} : vector<128x128xi32>
    %2 = vector.broadcast %0 : vector<1x128xi32> to vector<128x128xi32>
    %3 = arith.cmpi eq, %1, %2 : vector<128x128xi32>
    %4 = arith.extui %3 : vector<128x128xi1> to vector<128x128xi32>
    %5 = arith.sitofp %4 : vector<128x128xi32> to vector<128x128xf32>
    %6 = arith.truncf %5 : vector<128x128xf32> to vector<128x128xbf16>
    %c0_i32 = arith.constant 0 : i32
    %7 = arith.cmpi eq, %arg0, %c0_i32 : i32
    %c0_i32_1 = arith.constant 0 : i32
    %8 = arith.cmpi eq, %arg1, %c0_i32_1 : i32
    %9 = arith.andi %7, %8 : i1
    %10 = arith.extui %9 : i1 to i32
    %c0_i32_2 = arith.constant 0 : i32
    %11 = arith.cmpi ne, %10, %c0_i32_2 : i32
    scf.if %11 {
      %cst = arith.constant 0.000000e+00 : f32
      %23 = vector.broadcast %cst : f32 to vector<128x8xf32>
      %c0_9 = arith.constant 0 : index
      %c0_10 = arith.constant 0 : index
      %24 = vector.load %arg6[%c0_9, %c0_10] : memref<128x8xf32, #tpu.memory_space<vmem>>, vector<128x8xf32>
      tpu.vector_store %arg6[%c0_9, %c0_10], %23 {strides = array<i32>} : memref<128x8xf32, #tpu.memory_space<vmem>>, vector<128x8xf32>,
      %cst_11 = arith.constant 0.000000e+00 : f32
      %25 = vector.broadcast %cst_11 : f32 to vector<128x8xf32>
      %c0_12 = arith.constant 0 : index
      %c0_13 = arith.constant 0 : index
      %26 = vector.load %arg5[%c0_12, %c0_13] : memref<128x8xf32, #tpu.memory_space<vmem>>, vector<128x8xf32>
      tpu.vector_store %arg5[%c0_12, %c0_13], %25 {strides = array<i32>} : memref<128x8xf32, #tpu.memory_space<vmem>>, vector<128x8xf32>,
    } else {
    }
    %c0_i32_3 = arith.constant 0 : i32
    %12 = arith.cmpi eq, %arg0, %c0_i32_3 : i32
    %13 = arith.extui %12 : i1 to i32
    %c0_i32_4 = arith.constant 0 : i32
    %14 = arith.cmpi ne, %13, %c0_i32_4 : i32
    scf.if %14 {
      %c0_9 = arith.constant 0 : index
      %c0_10 = arith.constant 0 : index
      %23 = vector.load %arg6[%c0_9, %c0_10] : memref<128x8xf32, #tpu.memory_space<vmem>>, vector<128x8xf32>
      %c0_11 = arith.constant 0 : index
      %c0_12 = arith.constant 0 : index
      %24 = vector.load %arg4[%c0_11, %c0_12] : memref<128x8xbf16, #tpu.memory_space<vmem>>, vector<128x8xbf16>
      %cst = arith.constant dense<0.000000e+00> : vector<128x8xf32>
      %25 = tpu.matmul %6, %24, %cst {dimension_numbers = #tpu.dot_dimension_numbers<[1], [0], [0], [1], [0, 0, 1, 1], [], []>} : vector<128x128xbf16>, vector<128x8xbf16>, vector<128x8xf32> -> vector<128x8xf32>
      %26 = arith.addf %23, %25 : vector<128x8xf32>
      %c0_13 = arith.constant 0 : index
      %c0_14 = arith.constant 0 : index
      %27 = vector.load %arg6[%c0_13, %c0_14] : memref<128x8xf32, #tpu.memory_space<vmem>>, vector<128x8xf32>
      tpu.vector_store %arg6[%c0_13, %c0_14], %26 {strides = array<i32>} : memref<128x8xf32, #tpu.memory_space<vmem>>, vector<128x8xf32>,
    } else {
    }
    %c1_i32 = arith.constant 1 : i32
    %15 = arith.cmpi eq, %arg0, %c1_i32 : i32
    %c0_i32_5 = arith.constant 0 : i32
    %16 = arith.cmpi eq, %arg1, %c0_i32_5 : i32
    %17 = arith.andi %15, %16 : i1
    %18 = arith.extui %17 : i1 to i32
    %c0_i32_6 = arith.constant 0 : i32
    %19 = arith.cmpi ne, %18, %c0_i32_6 : i32
    scf.if %19 {
      %c0_9 = arith.constant 0 : index
      %c0_10 = arith.constant 0 : index
      %23 = vector.load %arg6[%c0_9, %c0_10] : memref<128x8xf32, #tpu.memory_space<vmem>>, vector<128x8xf32>
      %24 = arith.truncf %23 : vector<128x8xf32> to vector<128x8xbf16>
      %c0_11 = arith.constant 0 : index
      %c0_12 = arith.constant 0 : index
      %25 = vector.load %arg7[%c0_11, %c0_12] : memref<128x8xbf16, #tpu.memory_space<vmem>>, vector<128x8xbf16>
      tpu.vector_store %arg7[%c0_11, %c0_12], %24 {strides = array<i32>} : memref<128x8xbf16, #tpu.memory_space<vmem>>, vector<128x8xbf16>,
    } else {
    }
    %c1_i32_7 = arith.constant 1 : i32
    %20 = arith.cmpi eq, %arg0, %c1_i32_7 : i32
    %21 = arith.extui %20 : i1 to i32
    %c0_i32_8 = arith.constant 0 : i32
    %22 = arith.cmpi ne, %21, %c0_i32_8 : i32
    scf.if %22 {
      %c0_9 = arith.constant 0 : index
      %c0_10 = arith.constant 0 : index
      %23 = vector.load %arg3[%c0_9, %c0_10] : memref<128x1xi32, #tpu.memory_space<vmem>>, vector<128x1xi32>
      %24 = tpu.iota {dimensions = array<i32: 1>} : vector<128x128xi32>
      %25 = vector.broadcast %23 : vector<128x1xi32> to vector<128x128xi32>
      %26 = arith.cmpi eq, %24, %25 : vector<128x128xi32>
      %27 = arith.extui %26 : vector<128x128xi1> to vector<128x128xi32>
      %28 = arith.sitofp %27 : vector<128x128xi32> to vector<128x128xf32>
      %29 = arith.truncf %28 : vector<128x128xf32> to vector<128x128xbf16>
      %c0_11 = arith.constant 0 : index
      %c0_12 = arith.constant 0 : index
      %30 = vector.load %arg7[%c0_11, %c0_12] : memref<128x8xbf16, #tpu.memory_space<vmem>>, vector<128x8xbf16>
      %cst = arith.constant dense<0.000000e+00> : vector<128x8xf32>
      %31 = tpu.matmul %29, %30, %cst {dimension_numbers = #tpu.dot_dimension_numbers<[1], [0], [0], [1], [0, 0, 1, 1], [], []>} : vector<128x128xbf16>, vector<128x8xbf16>, vector<128x8xf32> -> vector<128x8xf32>
      %c0_13 = arith.constant 0 : index
      %c0_14 = arith.constant 0 : index
      %32 = vector.load %arg5[%c0_13, %c0_14] : memref<128x8xf32, #tpu.memory_space<vmem>>, vector<128x8xf32>
      %33 = arith.truncf %31 : vector<128x8xf32> to vector<128x8xbf16>
      %cst_15 = arith.constant dense<0.000000e+00> : vector<128x8xf32>
      %34 = tpu.matmul %6, %33, %cst_15 {dimension_numbers = #tpu.dot_dimension_numbers<[1], [0], [0], [1], [0, 0, 1, 1], [], []>} : vector<128x128xbf16>, vector<128x8xbf16>, vector<128x8xf32> -> vector<128x8xf32>
      %35 = arith.addf %32, %34 : vector<128x8xf32>
      %c0_16 = arith.constant 0 : index
      %c0_17 = arith.constant 0 : index
      %36 = vector.load %arg5[%c0_16, %c0_17] : memref<128x8xf32, #tpu.memory_space<vmem>>, vector<128x8xf32>
      tpu.vector_store %arg5[%c0_16, %c0_17], %35 {strides = array<i32>} : memref<128x8xf32, #tpu.memory_space<vmem>>, vector<128x8xf32>,
    } else {
    }
    return
  }
  func.func @transform_0(%arg0: i32, %arg1: i32) -> (i32, i32) {
    %c0_i32 = arith.constant 0 : i32
    %c0_i32_0 = arith.constant 0 : i32
    return %c0_i32, %arg1 : i32, i32
  }
  func.func @transform_1(%arg0: i32, %arg1: i32) -> (i32, i32) {
    %0 = arith.muli %arg1, %arg0 : i32
    %c0_i32 = arith.constant 0 : i32
    %c0_i32_0 = arith.constant 0 : i32
    return %0, %c0_i32 : i32, i32
  }
  func.func @transform_2(%arg0: i32, %arg1: i32) -> (i32, i32) {
    %c1_i32 = arith.constant 1 : i32
    %0 = arith.subi %c1_i32, %arg0 : i32
    %1 = arith.muli %arg1, %0 : i32
    %c0_i32 = arith.constant 0 : i32
    %c0_i32_0 = arith.constant 0 : i32
    return %1, %c0_i32 : i32, i32
  }
  func.func @transform_3(%arg0: i32, %arg1: i32) -> (i32, i32) {
    %c0_i32 = arith.constant 0 : i32
    %c0_i32_0 = arith.constant 0 : i32
    %c0_i32_1 = arith.constant 0 : i32
    return %c0_i32, %c0_i32_0 : i32, i32
  }
}

</mosaic_0001>

<bundles_post_ra>
// kernel: tpu_custom_call.1
= control target key start
LH: loop header
LB: loop body
LE: loop exit
PB: predicated region body
PF: predicated region fallthrough
CT: control target
= control target key end

     0   :  { %s1419_s12 = smov 0   ;;  %s1421_s13 = smov 0   ;;  %s1942_s0 = inlined_call_operand.vmem [shape: s32[1,384], index: 0, kind: input, shape index: {}]   ;;  %s1943_s1 = inlined_call_operand.vmem [shape: s32[384,1], index: 1, kind: input, shape index: {}]   ;;  %s1944_s2 = inlined_call_operand.vmem [shape: bf16[384,8], index: 2, kind: input, shape index: {}]   ;;  %s1945_s3 = inlined_call_operand.vmem [shape: f32[128,8], index: 3, kind: output, shape index: {}]  }
   0x1   :  { %s1423_s14 = smov 0   ;;  %s1425_s15 = smov 0  }
   0x2   :  { %s1427_s16 = smov 0  }
   0x3 LB: > { %s22_s17 = sadd.s32 1, %s1385_s14  ;;  %s25_s18 = sadd.s32 1, %s1389_s15  ;;  %s1393_s16 = sphi %s1427_s16, %s13_s16   ;;  %s1389_s15 = sphi %s1425_s15, %s1974_s15   ;;  %s1385_s14 = sphi %s1423_s14, %s1973_s14   ;;  %s1381_s13 = sphi %s1421_s13, %s1972_s13   ;;  %s1377_s12 = sphi %s1419_s12, %s1971_s12  }
   0x4   : > { %p23_p0 = scmp.ge.s32.totalorder %s22_s17, 3  ;;  %p1043_p1 = scmp.ge.s32.totalorder %s1393_s16, 1 }
   0x5   : > { %p176_p2 = scmp.lt.s32.totalorder %s1393_s16, 7 }
   0x6   : > { %s1976_s17 = smov (%p23_p0, %s22_s17), 0  ;;  %s1978_s18 = smov (!%p23_p0, %s25_s18), %s1389_s15 }
   0x7   : > { %p177_p3 = pnand %p1043_p1, %p176_p2  ;;  %p27_p4 = scmp.ge.s32.totalorder %s1978_s18, 2 }
   0x8   : > { %p206_p5 = scmp.lt.s32.totalorder (!%p177_p3), %s1377_s12, 2  ;;  %s209_s19 = smul.u32 (!%p177_p3), %s1377_s12, %s1381_s13  ;;  %v229_v0 = vlaneseq (!%p177_p3) }
   0x9   : > { %s1980_s18 = smov (%p27_p4, %s1978_s18), 0  ;;  %180 = sbr.rel (%p177_p3) target bundleno = 939 (0x3ab), region = 32 }
   0xa   : > { %s217_s20 = ssub.s32 (!%p177_p3), 1, %s1381_s13  ;;  %p306_p6 = scmp.eq.s32.totalorder (!%p177_p3), %s1381_s13, 0  ;;  %v1460_v1 = vshrl.u32 (!%p177_p3), %v229_v0, 7 }
   0xb   : > { %s1044_s22 = sshll.u32 (!%p177_p3), %s209_s19, 4  ;;  %s1463_s23 = smul.u32 (!%p177_p3), %s1377_s12, %s217_s20 }
   0xc   : > { %p211_p7 = scmp.lt.s32.totalorder (!%p177_p3), %s1044_s22, 47  ;;  %v1469_v2 = vadd.s32 (!%p177_p3), 8, %v1460_v1  ;;  %v1472_v3 = vadd.s32 (!%p177_p3), 16, %v1460_v1  ;;  %v1475_v4 = vadd.s32 (!%p177_p3), 24, %v1460_v1  ;;  %v1478_v5 = vadd.s32 (!%p177_p3), 32, %v1460_v1  ;;  %p307_p9 = scmp.eq.s32.totalorder (!%p177_p3), %s1377_s12, 0 }
   0xd   : > { %s1046_s27 = sshll.u32 (!%p177_p3), %s1463_s23, 4  ;;  %v1484_v7 = vadd.s32 (!%p177_p3), 40, %v1460_v1  ;;  %v1487_v8 = vadd.s32 (!%p177_p3), 48, %v1460_v1  ;;  %v1490_v9 = vadd.s32 (!%p177_p3), 56, %v1460_v1  ;;  %v1493_v10 = vadd.s32 (!%p177_p3), 64, %v1460_v1 }
   0xe   : > { %v1496_v11 = vadd.s32 (!%p177_p3), 72, %v1460_v1  ;;  %v1499_v12 = vadd.s32 (!%p177_p3), 80, %v1460_v1  ;;  %v1502_v13 = vadd.s32 (!%p177_p3), 88, %v1460_v1  ;;  %p1504_p8 = scmp.lt.s32.totalorder (!%p177_p3), %s1046_s27, 47  ;;  %v1509_v14 = vadd.s32 (!%p177_p3), 96, %v1460_v1  ;;  %p308_p10 = pnand (!%p177_p3), %p307_p9, %p306_p6 }
   0xf   : > { %v1512_v15 = vadd.s32 (!%p177_p3), 104, %v1460_v1  ;;  %v1515_v16 = vadd.s32 (!%p177_p3), 112, %v1460_v1  ;;  %v1518_v17 = vadd.s32 (!%p177_p3), 120, %v1460_v1 }
  0x10   : > { %s207_s21 = scalar_select %p206_p5, %s1377_s12, 2 }
  0x11   : > { %s1982_s22 = smov (!%p211_p7, %s1044_s22), 47  ;;  %s1984_s27 = smov (!%p1504_p8, %s1046_s27), 47 }
  0x12   : > { %s208_s26 = scalar_lea.vmem %s1942_s0, %s207_s21  ;;  %s1045_s29 = sshll.u32 %s1982_s22, 3  ;;  %vm312_vm7 = vcmask (!%p308_p10), 64512   ;;  %v1395_v18 = vmov (!%p308_p10), 0.0  }
  0x13   : > { %v1481_v6 = vld [vmem:[%s208_s26] ss:$0 sm:$0xff]  ;;  %s1532_s5 = scalar_lea.vmem %s1943_s1, %s1045_s29  ;;  %s1047_s6 = sshll.u32 %s1984_s27, 2  ;;  %313 = vst.msk [vmem:[#allocation2] sm:$0xff] (!%p308_p10), %vm312_vm7, %v1395_v18  ;;  %314 = vst.msk [vmem:[#allocation2 + $0x8] sm:$0xff] (!%p308_p10), %vm312_vm7, %v1395_v18 }
  0x14   : > { %vm250_vm0 = vcmp.eq.s32.totalorder %v1460_v1, %v1481_v6  ;;  %vm251_vm1 = vcmp.eq.s32.totalorder %v1469_v2, %v1481_v6  ;;  %vm252_vm2 = vcmp.eq.s32.totalorder %v1472_v3, %v1481_v6  ;;  %vm253_vm3 = vcmp.eq.s32.totalorder %v1475_v4, %v1481_v6  ;;  %s1567_s9 = scalar_lea.vmem %s1944_s2, %s1047_s6  ;;  %311 = sbr.rel (%p308_p10) target bundleno = 37 (0x25), region = 36  ;;  %315 = vst.msk [vmem:[#allocation2 + $0x10] sm:$0xff] (!%p308_p10), %vm312_vm7, %v1395_v18 }
  0x15   : > { %vm1951_vm4 = vcmp.eq.s32.totalorder %v1478_v5, %v1481_v6  ;;  %vm1950_vm5 = vcmp.eq.s32.totalorder %v1484_v7, %v1481_v6  ;;  %vm1955_vm6 = vcmp.eq.s32.totalorder %v1487_v8, %v1481_v6  ;;  %vm1947_vm8 = vcmp.eq.s32.totalorder %v1493_v10, %v1481_v6  ;;  %316 = vst.msk [vmem:[#allocation2 + $0x18] sm:$0xff] (!%p308_p10), %vm312_vm7, %v1395_v18 }
  0x16   : > { %vm1946_vm9 = vcmp.eq.s32.totalorder %v1496_v11, %v1481_v6  ;;  %vm1949_vm10 = vcmp.eq.s32.totalorder %v1499_v12, %v1481_v6  ;;  %vm1948_vm11 = vcmp.eq.s32.totalorder %v1502_v13, %v1481_v6  ;;  %vm1954_vm12 = vcmp.eq.s32.totalorder %v1509_v14, %v1481_v6  ;;  %317 = vst.msk [vmem:[#allocation2 + $0x20] sm:$0xff] (!%p308_p10), %vm312_vm7, %v1395_v18 }
  0x17   : > { %vm1953_vm13 = vcmp.eq.s32.totalorder %v1512_v15, %v1481_v6  ;;  %vm1952_vm14 = vcmp.eq.s32.totalorder %v1515_v16, %v1481_v6  ;;  %318 = vst.msk [vmem:[#allocation2 + $0x28] sm:$0xff] (!%p308_p10), %vm312_vm7, %v1395_v18  ;;  %319 = vst.msk [vmem:[#allocation2 + $0x30] sm:$0xff] (!%p308_p10), %vm312_vm7, %v1395_v18 }
  0x18   : > { %320 = vst.msk [vmem:[#allocation2 + $0x38] sm:$0xff] (!%p308_p10), %vm312_vm7, %v1395_v18  ;;  %321 = vst.msk [vmem:[#allocation2 + $0x40] sm:$0xff] (!%p308_p10), %vm312_vm7, %v1395_v18 }
  0x19   : > { %322 = vst.msk [vmem:[#allocation2 + $0x48] sm:$0xff] (!%p308_p10), %vm312_vm7, %v1395_v18  ;;  %323 = vst.msk [vmem:[#allocation2 + $0x50] sm:$0xff] (!%p308_p10), %vm312_vm7, %v1395_v18 }
  0x1a   : > { %324 = vst.msk [vmem:[#allocation2 + $0x58] sm:$0xff] (!%p308_p10), %vm312_vm7, %v1395_v18  ;;  %325 = vst.msk [vmem:[#allocation2 + $0x60] sm:$0xff] (!%p308_p10), %vm312_vm7, %v1395_v18 }
  0x1b   : > { %326 = vst.msk [vmem:[#allocation2 + $0x68] sm:$0xff] %vm312_vm7, %v1395_v18  ;;  %327 = vst.msk [vmem:[#allocation2 + $0x70] sm:$0xff] %vm312_vm7, %v1395_v18 }
  0x1c   : > { %328 = vst.msk [vmem:[#allocation2 + $0x78] sm:$0xff] %vm312_vm7, %v1395_v18  ;;  %329 = vst.msk [vmem:[%s1945_s3] sm:$0xff] %vm312_vm7, %v1395_v18 }
  0x1d   : > { %330 = vst.msk [vmem:[%s1945_s3 + $0x8] sm:$0xff] %vm312_vm7, %v1395_v18  ;;  %331 = vst.msk [vmem:[%s1945_s3 + $0x10] sm:$0xff] %vm312_vm7, %v1395_v18 }
  0x1e   : > { %332 = vst.msk [vmem:[%s1945_s3 + $0x18] sm:$0xff] %vm312_vm7, %v1395_v18  ;;  %333 = vst.msk [vmem:[%s1945_s3 + $0x20] sm:$0xff] %vm312_vm7, %v1395_v18 }
  0x1f   : > { %334 = vst.msk [vmem:[%s1945_s3 + $0x28] sm:$0xff] %vm312_vm7, %v1395_v18  ;;  %335 = vst.msk [vmem:[%s1945_s3 + $0x30] sm:$0xff] %vm312_vm7, %v1395_v18 }
  0x20   : > { %336 = vst.msk [vmem:[%s1945_s3 + $0x38] sm:$0xff] %vm312_vm7, %v1395_v18  ;;  %337 = vst.msk [vmem:[%s1945_s3 + $0x40] sm:$0xff] %vm312_vm7, %v1395_v18 }
  0x21   : > { %338 = vst.msk [vmem:[%s1945_s3 + $0x48] sm:$0xff] %vm312_vm7, %v1395_v18  ;;  %339 = vst.msk [vmem:[%s1945_s3 + $0x50] sm:$0xff] %vm312_vm7, %v1395_v18 }
  0x22   : > { %340 = vst.msk [vmem:[%s1945_s3 + $0x58] sm:$0xff] %vm312_vm7, %v1395_v18  ;;  %341 = vst.msk [vmem:[%s1945_s3 + $0x60] sm:$0xff] %vm312_vm7, %v1395_v18 }
  0x23   : > { %342 = vst.msk [vmem:[%s1945_s3 + $0x68] sm:$0xff] %vm312_vm7, %v1395_v18  ;;  %343 = vst.msk [vmem:[%s1945_s3 + $0x70] sm:$0xff] %vm312_vm7, %v1395_v18 }
  0x24   : > { %344 = vst.msk [vmem:[%s1945_s3 + $0x78] sm:$0xff] %vm312_vm7, %v1395_v18 }
  0x25 PF: > { %p1065_p11 = scmp.ne.s32.totalorder %s1381_s13, 0 }
  0x26   : > { %v1345_v19 = vld [vmem:[%s1567_s9] sm:$0xff] (!%p1065_p11)   ;;  %v1346_v20 = vld [vmem:[%s1567_s9 + $0x8] sm:$0xff] (!%p1065_p11)   ;;  %v1347_v21 = vld [vmem:[%s1567_s9 + $0x10] sm:$0xff] (!%p1065_p11)   ;;  %v1396_v23 = vmov (!%p1065_p11), 1.0|1.0  }
  0x27   : > { %347 = sbr.rel (%p1065_p11) target bundleno = 297 (0x129), region = 40  ;;  %1189 = vmatprep.subr.bf16.mxu0 (!%p1065_p11), %v1345_v19  ;;  %1285 = vmatprep.subr.bf16.mxu1 (!%p1065_p11), %v1345_v19  ;;  %v1348_v22 = vld [vmem:[%s1567_s9 + $0x18] sm:$0xff] (!%p1065_p11)   ;;  %vm1074_vm7 = vmpackc.low (!%p1065_p11), %vm251_vm1, %vm250_vm0  ;;  %v1349_v24 = vld [vmem:[%s1567_s9 + $0x20] sm:$0xff] (!%p1065_p11)  }
  0x28   : > { %1190 = vmatpush3.bf16.msra.mxu0 (!%p1065_p11), %v1345_v19  ;;  %1293 = vmatpush3.bf16.msra.mxu1 (!%p1065_p11), %v1345_v19  ;;  %vm1082_vm15 = vmpackc.low (!%p1065_p11), %vm1946_vm9, %vm1947_vm8  ;;  %v1350_v25 = vld [vmem:[%s1567_s9 + $0x28] sm:$0xff] (!%p1065_p11)   ;;  %v1351_v26 = vld [vmem:[%s1567_s9 + $0x30] sm:$0xff] (!%p1065_p11)  }
  0x29   : > { %1191 = vmatprep.subr.bf16.mxu0 (!%p1065_p11), %v1346_v20  ;;  %1286 = vmatprep.subr.bf16.mxu1 (!%p1065_p11), %v1346_v20  ;;  %v1352_v27 = vld [vmem:[%s1567_s9 + $0x38] sm:$0xff] (!%p1065_p11)   ;;  %vm1078_vm9 = vmpackc.low (!%p1065_p11), %vm1950_vm5, %vm1951_vm4  ;;  %vm1958_vm5 = vcmp.eq.s32.totalorder (!%p1065_p11), %v1518_v17, %v1481_v6  ;;  %v350_v28 = vld [vmem:[#allocation2 + $0x10] sm:$0xff] (!%p1065_p11) }
  0x2a   : > { %1205 = vmatprep.mubr.msk.bf16.mxu0 (!%p1065_p11), %vm1074_vm7, %v1396_v23  ;;  %1213 = vmatprep.mubr.msk.bf16.mxu1 (!%p1065_p11), %vm1082_vm15, %v1396_v23  ;;  %vm1076_vm15 = vmpackc.low (!%p1065_p11), %vm253_vm3, %vm252_vm2  ;;  %v358_v29 = vld [vmem:[#allocation2 + $0x50] sm:$0xff] (!%p1065_p11)  ;;  %v348_v30 = vld [vmem:[#allocation2] sm:$0xff] (!%p1065_p11) }
  0x2b   : > { %vm1084_vm7 = vmpackc.low (!%p1065_p11), %vm1948_vm11, %vm1949_vm10  ;;  %vm1957_vm11 = vcmp.eq.s32.totalorder (!%p1065_p11), %v1490_v9, %v1481_v6  ;;  %v356_v31 = vld [vmem:[#allocation2 + $0x40] sm:$0xff] (!%p1065_p11)  ;;  %v351_v34 = vld [vmem:[#allocation2 + $0x18] sm:$0xff] (!%p1065_p11) }
  0x2c   : > { %1192 = vmatpush3.bf16.msra.mxu0 (!%p1065_p11), %v1346_v20  ;;  %1294 = vmatpush3.bf16.msra.mxu1 (!%p1065_p11), %v1346_v20  ;;  %vm1086_vm8 = vmpackc.low (!%p1065_p11), %vm1953_vm13, %vm1954_vm12  ;;  %v359_v35 = vld [vmem:[#allocation2 + $0x58] sm:$0xff] (!%p1065_p11)  ;;  %v349_v40 = vld [vmem:[#allocation2 + $0x8] sm:$0xff] (!%p1065_p11) }
  0x2d   : > { %1193 = vmatprep.subr.bf16.mxu0 (!%p1065_p11), %v1347_v21  ;;  %1287 = vmatprep.subr.bf16.mxu1 (!%p1065_p11), %v1347_v21  ;;  %vm1080_vm10 = vmpackc.low (!%p1065_p11), %vm1957_vm11, %vm1955_vm6  ;;  %v357_v41 = vld [vmem:[#allocation2 + $0x48] sm:$0xff] (!%p1065_p11)  ;;  %v354_v52 = vld [vmem:[#allocation2 + $0x30] sm:$0xff] (!%p1065_p11) }
  0x2e   : > { %vm1088_vm4 = vmpackc.low %vm1958_vm5, %vm1952_vm14  ;;  %v362_v53 = vld [vmem:[#allocation2 + $0x70] sm:$0xff]  ;;  %v352_v54 = vld [vmem:[#allocation2 + $0x20] sm:$0xff] }
  0x2f   : > { %v360_v55 = vld [vmem:[#allocation2 + $0x60] sm:$0xff]  ;;  %v355_v58 = vld [vmem:[#allocation2 + $0x38] sm:$0xff]  ;;  %v353_v18 = vld [vmem:[#allocation2 + $0x28] sm:$0xff] }
  0x30   : > { %1194 = vmatpush3.bf16.msra.mxu0 %v1347_v21  ;;  %1295 = vmatpush3.bf16.msra.mxu1 %v1347_v21  ;;  %v363_v59 = vld [vmem:[#allocation2 + $0x78] sm:$0xff]  ;;  %v361_v19 = vld [vmem:[#allocation2 + $0x68] sm:$0xff] }
  0x31   : > { %1195 = vmatprep.subr.bf16.mxu0 %v1348_v22  ;;  %1288 = vmatprep.subr.bf16.mxu1 %v1348_v22 }
  0x34   : > { %1196 = vmatpush3.bf16.msra.mxu0 %v1348_v22  ;;  %1296 = vmatpush3.bf16.msra.mxu1 %v1348_v22 }
  0x35   : > { %1197 = vmatprep.subr.bf16.mxu0 %v1349_v24  ;;  %1289 = vmatprep.subr.bf16.mxu1 %v1349_v24 }
  0x38   : > { %1198 = vmatpush3.bf16.msra.mxu0 %v1349_v24  ;;  %1297 = vmatpush3.bf16.msra.mxu1 %v1349_v24 }
  0x39   : > { %1199 = vmatprep.subr.bf16.mxu0 %v1350_v25  ;;  %1290 = vmatprep.subr.bf16.mxu1 %v1350_v25 }
  0x3c   : > { %1200 = vmatpush3.bf16.msra.mxu0 %v1350_v25  ;;  %1298 = vmatpush3.bf16.msra.mxu1 %v1350_v25 }
  0x3d   : > { %1201 = vmatprep.subr.bf16.mxu0 %v1351_v26  ;;  %1291 = vmatprep.subr.bf16.mxu1 %v1351_v26 }
  0x40   : > { %1202 = vmatpush3.bf16.msra.mxu0 %v1351_v26  ;;  %1299 = vmatpush3.bf16.msra.mxu1 %v1351_v26 }
  0x41   : > { %1203 = vmatprep.subr.bf16.mxu0 %v1352_v27  ;;  %1292 = vmatprep.subr.bf16.mxu1 %v1352_v27 }
  0x44   : > { %1204 = vmatpush3.bf16.msra.mxu0 %v1352_v27  ;;  %1300 = vmatpush3.bf16.msra.mxu1 %v1352_v27 }
  0x47   : > { %1206 = vmatmul.mubr.msk.bf16.vlgmr.msra.gmra.mrb[0].mxu0 %vm1076_vm15, %v1396_v23  ;;  %1214 = vmatmul.mubr.msk.bf16.vlgmr.msra.gmra.mrb[0].mxu1 %vm1084_vm7, %v1396_v23 }
  0x48   : > { %1209 = vmatprep.mubr.msk.bf16.mxu0 %vm1078_vm9, %v1396_v23  ;;  %1217 = vmatprep.mubr.msk.bf16.mxu1 %vm1086_vm8, %v1396_v23  ;;  %vm541_vm8 = vcmask 64512  }
  0x4f   : > { %1210 = vmatmul.mubr.msk.bf16.gmra.mrb[4].mxu0 %vm1080_vm10, %v1396_v23  ;;  %1218 = vmatmul.mubr.msk.bf16.gmra.mrb[4].mxu1 %vm1088_vm4, %v1396_v23 }
 0x11a   : > { %v1207_v32 = vpop.f32.mrb[0].mxu0  ;;  %v1215_v33 = vpop.f32.mrb[0].mxu1 }
 0x11b   : > { %v527_v36 = vadd.f32 %v1207_v32, %v350_v28  ;;  %v535_v37 = vadd.f32 %v1215_v33, %v358_v29  ;;  %v462_v38 = vpop.f32.mrb[1].mxu0  ;;  %v494_v39 = vpop.f32.mrb[1].mxu1 }
 0x11c   : > { %v525_v42 = vadd.f32 %v462_v38, %v348_v30  ;;  %v533_v43 = vadd.f32 %v494_v39, %v356_v31  ;;  %v1208_v44 = vpop.f32.mrb[2].mxu0  ;;  %v1216_v45 = vpop.f32.mrb[2].mxu1 }
 0x11d   : > { %544 = vst.msk [vmem:[#allocation2 + $0x10] sm:$0xff] %vm541_vm8, %v527_v36  ;;  %552 = vst.msk [vmem:[#allocation2 + $0x50] sm:$0xff] %vm541_vm8, %v535_v37  ;;  %v528_v46 = vadd.f32 %v1208_v44, %v351_v34  ;;  %v536_v47 = vadd.f32 %v1216_v45, %v359_v35  ;;  %v465_v48 = vpop.f32.mrb[3].mxu0  ;;  %v497_v49 = vpop.f32.mrb[3].mxu1 }
 0x11e   : > { %542 = vst.msk [vmem:[#allocation2] sm:$0xff] %vm541_vm8, %v525_v42  ;;  %550 = vst.msk [vmem:[#allocation2 + $0x40] sm:$0xff] %vm541_vm8, %v533_v43  ;;  %v526_v50 = vadd.f32 %v465_v48, %v349_v40  ;;  %v534_v51 = vadd.f32 %v497_v49, %v357_v41 }
 0x11f   : > { %545 = vst.msk [vmem:[#allocation2 + $0x18] sm:$0xff] %vm541_vm8, %v528_v46  ;;  %553 = vst.msk [vmem:[#allocation2 + $0x58] sm:$0xff] %vm541_vm8, %v536_v47 }
 0x120   : > { %543 = vst.msk [vmem:[#allocation2 + $0x8] sm:$0xff] %vm541_vm8, %v526_v50  ;;  %551 = vst.msk [vmem:[#allocation2 + $0x48] sm:$0xff] %vm541_vm8, %v534_v51 }
 0x122   : > { %v1211_v56 = vpop.f32.mrb[4].mxu0  ;;  %v1219_v57 = vpop.f32.mrb[4].mxu1 }
 0x123   : > { %v531_v60 = vadd.f32 %v1211_v56, %v354_v52  ;;  %v539_v61 = vadd.f32 %v1219_v57, %v362_v53  ;;  %v478_v62 = vpop.f32.mrb[5].mxu0  ;;  %v510_v63 = vpop.f32.mrb[5].mxu1 }
 0x124   : > { %v529_v20 = vadd.f32 %v478_v62, %v352_v54  ;;  %v537_v21 = vadd.f32 %v510_v63, %v360_v55  ;;  %v1212_v22 = vpop.f32.mrb[6].mxu0  ;;  %v1220_v23 = vpop.f32.mrb[6].mxu1 }
 0x125   : > { %548 = vst.msk [vmem:[#allocation2 + $0x30] sm:$0xff] %vm541_vm8, %v531_v60  ;;  %556 = vst.msk [vmem:[#allocation2 + $0x70] sm:$0xff] %vm541_vm8, %v539_v61  ;;  %v532_v24 = vadd.f32 %v1212_v22, %v355_v58  ;;  %v540_v25 = vadd.f32 %v1220_v23, %v363_v59  ;;  %v481_v26 = vpop.f32.mrb[7].mxu0  ;;  %v513_v27 = vpop.f32.mrb[7].mxu1 }
 0x126   : > { %546 = vst.msk [vmem:[#allocation2 + $0x20] sm:$0xff] %vm541_vm8, %v529_v20  ;;  %554 = vst.msk [vmem:[#allocation2 + $0x60] sm:$0xff] %vm541_vm8, %v537_v21  ;;  %v530_v28 = vadd.f32 %v481_v26, %v353_v18  ;;  %v538_v29 = vadd.f32 %v513_v27, %v361_v19 }
 0x127   : > { %549 = vst.msk [vmem:[#allocation2 + $0x38] sm:$0xff] %vm541_vm8, %v532_v24  ;;  %557 = vst.msk [vmem:[#allocation2 + $0x78] sm:$0xff] %vm541_vm8, %v540_v25 }
 0x128   : > { %547 = vst.msk [vmem:[#allocation2 + $0x28] sm:$0xff] %vm541_vm8, %v530_v28  ;;  %555 = vst.msk [vmem:[#allocation2 + $0x68] sm:$0xff] %vm541_vm8, %v538_v29 }
 0x129 PF: > { %p558_p12 = scmp.eq.s32.totalorder %s1381_s13, 1 }
 0x12b   : > { %p559_p13 = pnand %p558_p12, %p307_p9 }
 0x12c   : > { %v563_v30 = vld [vmem:[#allocation2] sm:$0xff] (!%p559_p13)  ;;  %v564_v31 = vld [vmem:[#allocation2 + $0x8] sm:$0xff] (!%p559_p13)  ;;  %vm587_vm4 = vcmask (!%p559_p13), 64512   ;;  %v565_v32 = vld [vmem:[#allocation2 + $0x10] sm:$0xff] (!%p559_p13) }
 0x12d   : > { %562 = sbr.rel (%p559_p13) target bundleno = 309 (0x135), region = 44  ;;  %v579_v33 = vpack.c.bf16 (!%p559_p13), %v564_v31, %v563_v30  ;;  %v566_v34 = vld [vmem:[#allocation2 + $0x18] sm:$0xff] (!%p559_p13)  ;;  %v567_v35 = vld [vmem:[#allocation2 + $0x20] sm:$0xff] (!%p559_p13)  ;;  %v569_v39 = vld [vmem:[#allocation2 + $0x30] sm:$0xff] (!%p559_p13) }
 0x12e   : > { %v580_v37 = vpack.c.bf16 (!%p559_p13), %v566_v34, %v565_v32  ;;  %v570_v40 = vld [vmem:[#allocation2 + $0x38] sm:$0xff] (!%p559_p13)  ;;  %v571_v41 = vld [vmem:[#allocation2 + $0x40] sm:$0xff] (!%p559_p13)  ;;  %v572_v43 = vld [vmem:[#allocation2 + $0x48] sm:$0xff] (!%p559_p13) }
 0x12f   : > { %v568_v36 = vld [vmem:[#allocation2 + $0x28] sm:$0xff] (!%p559_p13)  ;;  %588 = vst.msk [vmem:[#allocation3] sm:$0xff] (!%p559_p13), %vm587_vm4, %v579_v33  ;;  %v582_v42 = vpack.c.bf16 (!%p559_p13), %v570_v40, %v569_v39  ;;  %v573_v44 = vld [vmem:[#allocation2 + $0x50] sm:$0xff] (!%p559_p13)  ;;  %v574_v45 = vld [vmem:[#allocation2 + $0x58] sm:$0xff] (!%p559_p13)  ;;  %v583_v46 = vpack.c.bf16 (!%p559_p13), %v572_v43, %v571_v41 }
 0x130   : > { %v581_v38 = vpack.c.bf16 (!%p559_p13), %v568_v36, %v567_v35  ;;  %589 = vst.msk [vmem:[#allocation3 + $0x8] sm:$0xff] (!%p559_p13), %vm587_vm4, %v580_v37  ;;  %v584_v47 = vpack.c.bf16 (!%p559_p13), %v574_v45, %v573_v44  ;;  %v575_v48 = vld [vmem:[#allocation2 + $0x60] sm:$0xff] (!%p559_p13)  ;;  %v576_v49 = vld [vmem:[#allocation2 + $0x68] sm:$0xff] (!%p559_p13)  ;;  %v577_v50 = vld [vmem:[#allocation2 + $0x70] sm:$0xff] (!%p559_p13) }
 0x131   : > { %591 = vst.msk [vmem:[#allocation3 + $0x18] sm:$0xff] (!%p559_p13), %vm587_vm4, %v582_v42  ;;  %v585_v51 = vpack.c.bf16 (!%p559_p13), %v576_v49, %v575_v48  ;;  %v578_v52 = vld [vmem:[#allocation2 + $0x78] sm:$0xff] (!%p559_p13)  ;;  %592 = vst.msk [vmem:[#allocation3 + $0x20] sm:$0xff] (!%p559_p13), %vm587_vm4, %v583_v46 }
 0x132   : > { %590 = vst.msk [vmem:[#allocation3 + $0x10] sm:$0xff] (!%p559_p13), %vm587_vm4, %v581_v38  ;;  %593 = vst.msk [vmem:[#allocation3 + $0x28] sm:$0xff] (!%p559_p13), %vm587_vm4, %v584_v47  ;;  %v586_v53 = vpack.c.bf16 (!%p559_p13), %v578_v52, %v577_v50 }
 0x133   : > { %594 = vst.msk [vmem:[#allocation3 + $0x30] sm:$0xff] (!%p559_p13), %vm587_vm4, %v585_v51 }
 0x134   : > { %595 = vst.msk [vmem:[#allocation3 + $0x38] sm:$0xff] %vm587_vm4, %v586_v53 }
 0x135 PF: > { %p1090_p0 = scmp.ne.s32.totalorder %s1381_s13, 1 }
 0x136   : > { %v601_v54 = vld [vmem:[%s1532_s5 + $0x10] sm:$0xff] (!%p1090_p0)  ;;  %v599_v55 = vld [vmem:[%s1532_s5] sm:$0xff] (!%p1090_p0)  ;;  %v1397_v56 = vmov (!%p1090_p0), 0   ;;  %v602_v57 = vld [vmem:[%s1532_s5 + $0x18] sm:$0xff] (!%p1090_p0)  ;;  %v616_v35 = vand.u32 (!%p1090_p0), 127, %v229_v0 }
 0x137   : > { %598 = sbr.rel (%p1090_p0) target bundleno = 939 (0x3ab), region = 48  ;;  %1354 = vset.pattern.permute.xlu1 (!%p1090_p0), %v1397_v56  ;;  %1353 = vset.pattern.permute.xlu0 (!%p1090_p0), %v1397_v56  ;;  %v600_v58 = vld [vmem:[%s1532_s5 + $0x8] sm:$0xff] (!%p1090_p0)  ;;  %v721_v59 = vld [vmem:[#allocation3] sm:$0xff] (!%p1090_p0)  ;;  %v606_v18 = vld [vmem:[%s1532_s5 + $0x38] sm:$0xff] (!%p1090_p0)  ;;  %v1398_v38 = vmov (!%p1090_p0), 1.0|1.0  }
 0x138   : > { %624 = vperm.xlu1 (!%p1090_p0), %1354, %v601_v54   ;;  %618 = vperm.xlu0 (!%p1090_p0), %1353, %v599_v55   ;;  %v722_v60 = vld [vmem:[#allocation3 + $0x8] sm:$0xff] (!%p1090_p0)  ;;  %v603_v62 = vld [vmem:[%s1532_s5 + $0x20] sm:$0xff] (!%p1090_p0)  ;;  %v605_v19 = vld [vmem:[%s1532_s5 + $0x30] sm:$0xff] (!%p1090_p0) }
 0x139   : > { %v604_v61 = vld [vmem:[%s1532_s5 + $0x28] sm:$0xff] (!%p1090_p0)  ;;  %1221 = vmatprep.subr.bf16.mxu0 (!%p1090_p0), %v721_v59  ;;  %v724_v20 = vld [vmem:[#allocation3 + $0x18] sm:$0xff] (!%p1090_p0)  ;;  %v607_v22 = vld [vmem:[%s1532_s5 + $0x40] sm:$0xff] (!%p1090_p0) }
 0x13a   : > { %1222 = vmatpush3.bf16.msra.mxu0 (!%p1090_p0), %v721_v59  ;;  %v723_v63 = vld [vmem:[#allocation3 + $0x10] sm:$0xff] (!%p1090_p0)  ;;  %v608_v21 = vld [vmem:[%s1532_s5 + $0x48] sm:$0xff] (!%p1090_p0)  ;;  %v725_v23 = vld [vmem:[#allocation3 + $0x20] sm:$0xff] (!%p1090_p0) }
 0x13b   : > { %1223 = vmatprep.subr.bf16.mxu0 (!%p1090_p0), %v722_v60  ;;  %v610_v24 = vld [vmem:[%s1532_s5 + $0x58] sm:$0xff] (!%p1090_p0)  ;;  %v609_v25 = vld [vmem:[%s1532_s5 + $0x50] sm:$0xff] (!%p1090_p0)  ;;  %v726_v26 = vld [vmem:[#allocation3 + $0x28] sm:$0xff] (!%p1090_p0) }
 0x13c   : > { %627 = vperm.xlu1 (!%p1090_p0), %1354, %v602_v57   ;;  %621 = vperm.xlu0 (!%p1090_p0), %1353, %v600_v58   ;;  %v612_v27 = vld [vmem:[%s1532_s5 + $0x68] sm:$0xff] (!%p1090_p0)  ;;  %v611_v28 = vld [vmem:[%s1532_s5 + $0x60] sm:$0xff] (!%p1090_p0)  ;;  %v727_v29 = vld [vmem:[#allocation3 + $0x30] sm:$0xff] (!%p1090_p0) }
 0x13d   : > { %v614_v30 = vld [vmem:[%s1532_s5 + $0x78] sm:$0xff] (!%p1090_p0)  ;;  %v613_v31 = vld [vmem:[%s1532_s5 + $0x70] sm:$0xff] (!%p1090_p0)  ;;  %v826_v4 = vld [vmem:[%s1945_s3] sm:$0xff] (!%p1090_p0) }
 0x13e   : > { %1224 = vmatpush3.bf16.msra.mxu0 %v722_v60  ;;  %v728_v32 = vld [vmem:[#allocation3 + $0x38] sm:$0xff]  ;;  %v828_v3 = vld [vmem:[%s1945_s3 + $0x10] sm:$0xff] }
 0x13f   : > { %1225 = vmatprep.subr.bf16.mxu0 %v723_v63 }
 0x140   : > { %633 = vperm.xlu1 %1354, %v604_v61   ;;  %630 = vperm.xlu0 %1353, %v603_v62  }
 0x142   : > { %1226 = vmatpush3.bf16.msra.mxu0 %v723_v63 }
 0x143   : > { %1227 = vmatprep.subr.bf16.mxu0 %v724_v20 }
 0x144   : > { %639 = vperm.xlu1 %1354, %v606_v18   ;;  %636 = vperm.xlu0 %1353, %v605_v19  }
 0x146   : > { %1228 = vmatpush3.bf16.msra.mxu0 %v724_v20 }
 0x147   : > { %1229 = vmatprep.subr.bf16.mxu0 %v725_v23 }
 0x148   : > { %645 = vperm.xlu1 %1354, %v608_v21   ;;  %642 = vperm.xlu0 %1353, %v607_v22  }
 0x14a   : > { %1230 = vmatpush3.bf16.msra.mxu0 %v725_v23 }
 0x14b   : > { %1231 = vmatprep.subr.bf16.mxu0 %v726_v26 }
 0x14c   : > { %651 = vperm.xlu1 %1354, %v610_v24   ;;  %648 = vperm.xlu0 %1353, %v609_v25  }
 0x14e   : > { %1232 = vmatpush3.bf16.msra.mxu0 %v726_v26  ;;  %v833_v26 = vld [vmem:[%s1945_s3 + $0x38] sm:$0xff] }
 0x14f   : > { %1233 = vmatprep.subr.bf16.mxu0 %v727_v29 }
 0x150   : > { %657 = vperm.xlu1 %1354, %v612_v27   ;;  %654 = vperm.xlu0 %1353, %v611_v28  }
 0x152   : > { %1234 = vmatpush3.bf16.msra.mxu0 %v727_v29  ;;  %v831_v29 = vld [vmem:[%s1945_s3 + $0x28] sm:$0xff] }
 0x153   : > { %1235 = vmatprep.subr.bf16.mxu0 %v728_v32 }
 0x154   : > { %663 = vperm.xlu1 %1354, %v614_v30   ;;  %660 = vperm.xlu0 %1353, %v613_v31  }
 0x156   : > { %1236 = vmatpush3.bf16.msra.mxu0 %v728_v32 }
 0x1b7   : > { %v625_v33 = vpop.permute.xlu1 %624  ;;  %v619_v34 = vpop.permute.xlu0 %618 }
 0x1b8   : > { %vm667_vm5 = vcmp.eq.s32.totalorder %v616_v35, %v625_v33  ;;  %vm665_vm11 = vcmp.eq.s32.totalorder %v616_v35, %v619_v34 }
 0x1bb   : > { %v628_v36 = vpop.permute.xlu1 %627  ;;  %v622_v37 = vpop.permute.xlu0 %621 }
 0x1bc   : > { %vm668_vm9 = vcmp.eq.s32.totalorder %v616_v35, %v628_v36  ;;  %vm666_vm10 = vcmp.eq.s32.totalorder %v616_v35, %v622_v37  ;;  %v834_v36 = vld [vmem:[%s1945_s3 + $0x40] sm:$0xff] }
 0x1bd   : > { %vm1109_vm15 = vmpackc.low %vm668_vm9, %vm667_vm5 }
 0x1be   : > { %vm1107_vm7 = vmpackc.low %vm666_vm10, %vm665_vm11 }
 0x1bf   : > { %1237 = vmatprep.mubr.msk.bf16.mxu0 %vm1107_vm7, %v1398_v38  ;;  %v634_v39 = vpop.permute.xlu1 %633  ;;  %v631_v40 = vpop.permute.xlu0 %630 }
 0x1c0   : > { %vm670_vm8 = vcmp.eq.s32.totalorder %v616_v35, %v634_v39  ;;  %1238 = vmatmul.mubr.msk.bf16.vlgmr.msra.gmra.mrb[0].mxu0 %vm1109_vm15, %v1398_v38  ;;  %vm669_vm4 = vcmp.eq.s32.totalorder %v616_v35, %v631_v40 }
 0x1c1   : > { %vm1111_vm14 = vmpackc.low %vm670_vm8, %vm669_vm4 }
 0x1c2   : > { %1241 = vmatprep.mubr.msk.bf16.mxu0 %vm1111_vm14, %v1398_v38 }
 0x1c3   : > { %v640_v0 = vpop.permute.xlu1 %639  ;;  %v637_v41 = vpop.permute.xlu0 %636 }
 0x1c4   : > { %vm672_vm13 = vcmp.eq.s32.totalorder %v616_v35, %v640_v0  ;;  %vm671_vm12 = vcmp.eq.s32.totalorder %v616_v35, %v637_v41  ;;  %v835_v0 = vld [vmem:[%s1945_s3 + $0x48] sm:$0xff] }
 0x1c5   : > { %vm1113_vm6 = vmpackc.low %vm672_vm13, %vm671_vm12 }
 0x1c7   : > { %v646_v42 = vpop.permute.xlu1 %645  ;;  %v643_v43 = vpop.permute.xlu0 %642 }
 0x1c8   : > { %vm674_vm5 = vcmp.eq.s32.totalorder %v616_v35, %v646_v42  ;;  %1242 = vmatmul.mubr.msk.bf16.gmra.mrb[4].mxu0 %vm1113_vm6, %v1398_v38  ;;  %vm673_vm9 = vcmp.eq.s32.totalorder %v616_v35, %v643_v43 }
 0x1c9   : > { %vm1115_vm10 = vmpackc.low %vm674_vm5, %vm673_vm9  ;;  %vm1960_vm9 = vcmp.eq.s32.totalorder %v1484_v7, %v1481_v6  ;;  %v829_v7 = vld [vmem:[%s1945_s3 + $0x18] sm:$0xff] }
 0x1ca   : > { %1245 = vmatprep.mubr.msk.bf16.mxu0 %vm1115_vm10, %v1398_v38  ;;  %vm1123_vm5 = vmpackc.low %vm251_vm1, %vm250_vm0  ;;  %vm1959_vm1 = vcmp.eq.s32.totalorder %v1478_v5, %v1481_v6 }
 0x1cb   : > { %v652_v44 = vpop.permute.xlu1 %651  ;;  %v649_v45 = vpop.permute.xlu0 %648  ;;  %1269 = vmatprep.mubr.msk.bf16.mxu1 %vm1123_vm5, %v1398_v38  ;;  %vm1125_vm0 = vmpackc.low %vm253_vm3, %vm252_vm2  ;;  %vm1963_vm2 = vcmp.eq.s32.totalorder %v1493_v10, %v1481_v6  ;;  %vm1964_vm3 = vcmp.eq.s32.totalorder %v1496_v11, %v1481_v6 }
 0x1cc   : > { %vm676_vm11 = vcmp.eq.s32.totalorder %v616_v35, %v652_v44  ;;  %vm675_vm15 = vcmp.eq.s32.totalorder %v616_v35, %v649_v45  ;;  %vm1127_vm10 = vmpackc.low %vm1960_vm9, %vm1959_vm1  ;;  %vm1970_vm1 = vcmp.eq.s32.totalorder %v1518_v17, %v1481_v6 }
 0x1cd   : > { %vm1117_vm7 = vmpackc.low %vm676_vm11, %vm675_vm15  ;;  %vm1961_vm11 = vcmp.eq.s32.totalorder %v1487_v8, %v1481_v6  ;;  %vm1962_vm15 = vcmp.eq.s32.totalorder %v1490_v9, %v1481_v6 }
 0x1cf   : > { %v658_v46 = vpop.permute.xlu1 %657  ;;  %v655_v47 = vpop.permute.xlu0 %654 }
 0x1d0   : > { %vm678_vm14 = vcmp.eq.s32.totalorder %v616_v35, %v658_v46  ;;  %1246 = vmatmul.mubr.msk.bf16.gmra.mrb[8].mxu0 %vm1117_vm7, %v1398_v38  ;;  %vm677_vm12 = vcmp.eq.s32.totalorder %v616_v35, %v655_v47  ;;  %vm1129_vm7 = vmpackc.low %vm1962_vm15, %vm1961_vm11  ;;  %v840_v46 = vld [vmem:[%s1945_s3 + $0x70] sm:$0xff]  ;;  %v838_v47 = vld [vmem:[%s1945_s3 + $0x60] sm:$0xff] }
 0x1d1   : > { %vm1119_vm13 = vmpackc.low %vm678_vm14, %vm677_vm12  ;;  %vm1965_vm12 = vcmp.eq.s32.totalorder %v1499_v12, %v1481_v6 }
 0x1d2   : > { %1249 = vmatprep.mubr.msk.bf16.mxu0 %vm1119_vm13, %v1398_v38  ;;  %vm1131_vm14 = vmpackc.low %vm1964_vm3, %vm1963_vm2  ;;  %vm1966_vm13 = vcmp.eq.s32.totalorder %v1502_v13, %v1481_v6 }
 0x1d3   : > { %v664_v48 = vpop.permute.xlu1 %663  ;;  %v661_v49 = vpop.permute.xlu0 %660 }
 0x1d4   : > { %vm680_vm6 = vcmp.eq.s32.totalorder %v616_v35, %v664_v48  ;;  %vm679_vm8 = vcmp.eq.s32.totalorder %v616_v35, %v661_v49  ;;  %v836_v35 = vld [vmem:[%s1945_s3 + $0x50] sm:$0xff]  ;;  %v841_v49 = vld [vmem:[%s1945_s3 + $0x78] sm:$0xff] }
 0x1d5   : > { %vm1121_vm4 = vmpackc.low %vm680_vm6, %vm679_vm8  ;;  %vm1967_vm8 = vcmp.eq.s32.totalorder %v1509_v14, %v1481_v6 }
 0x1d6   : > { %vm1133_vm6 = vmpackc.low %vm1966_vm13, %vm1965_vm12 }
 0x1d8   : > { %1250 = vmatmul.mubr.msk.bf16.gmra.mrb[12].mxu0 %vm1121_vm4, %v1398_v38  ;;  %vm1968_vm4 = vcmp.eq.s32.totalorder %v1512_v15, %v1481_v6  ;;  %v832_v15 = vld [vmem:[%s1945_s3 + $0x30] sm:$0xff] }
 0x1d9   : > { %vm1135_vm5 = vmpackc.low %vm1968_vm4, %vm1967_vm8 }
 0x293   : > { %v1239_v50 = vpop.f32.mrb[0].mxu0 }
 0x294   : > { %v763_v51 = vpop.f32.mrb[1].mxu0 }
 0x295   : > { %v1240_v52 = vpop.f32.mrb[2].mxu0 }
 0x296   : > { %v843_v53 = vpack.c.bf16 %v1240_v52, %v1239_v50  ;;  %v766_v54 = vpop.f32.mrb[3].mxu0  ;;  %v839_v52 = vld [vmem:[%s1945_s3 + $0x68] sm:$0xff] }
 0x297   : > { %v842_v55 = vpack.c.bf16 %v766_v54, %v763_v51 }
 0x299   : > { %1253 = vmatprep.subr.bf16.mxu1 %v842_v55 }
 0x29a   : > { %1254 = vmatpush3.bf16.msra.mxu1 %v842_v55 }
 0x29b   : > { %v1243_v56 = vpop.f32.mrb[4].mxu0  ;;  %1255 = vmatprep.subr.bf16.mxu1 %v843_v53 }
 0x29c   : > { %v779_v57 = vpop.f32.mrb[5].mxu0 }
 0x29d   : > { %v1244_v58 = vpop.f32.mrb[6].mxu0 }
 0x29e   : > { %v845_v59 = vpack.c.bf16 %v1244_v58, %v1243_v56  ;;  %v782_v1 = vpop.f32.mrb[7].mxu0  ;;  %1256 = vmatpush3.bf16.msra.mxu1 %v843_v53 }
 0x29f   : > { %v844_v60 = vpack.c.bf16 %v782_v1, %v779_v57 }
 0x2a1   : > { %1257 = vmatprep.subr.bf16.mxu1 %v844_v60 }
 0x2a2   : > { %1258 = vmatpush3.bf16.msra.mxu1 %v844_v60 }
 0x2a3   : > { %v1247_v2 = vpop.f32.mrb[8].mxu0  ;;  %1259 = vmatprep.subr.bf16.mxu1 %v845_v59 }
 0x2a4   : > { %v795_v61 = vpop.f32.mrb[9].mxu0 }
 0x2a5   : > { %v1248_v62 = vpop.f32.mrb[10].mxu0 }
 0x2a6   : > { %v847_v63 = vpack.c.bf16 %v1248_v62, %v1247_v2  ;;  %v798_v18 = vpop.f32.mrb[11].mxu0  ;;  %1260 = vmatpush3.bf16.msra.mxu1 %v845_v59 }
 0x2a7   : > { %v846_v19 = vpack.c.bf16 %v798_v18, %v795_v61 }
 0x2a9   : > { %1261 = vmatprep.subr.bf16.mxu1 %v846_v19 }
 0x2aa   : > { %1262 = vmatpush3.bf16.msra.mxu1 %v846_v19 }
 0x2ab   : > { %v1251_v20 = vpop.f32.mrb[12].mxu0  ;;  %1263 = vmatprep.subr.bf16.mxu1 %v847_v63 }
 0x2ac   : > { %v811_v21 = vpop.f32.mrb[13].mxu0 }
 0x2ad   : > { %v1252_v22 = vpop.f32.mrb[14].mxu0 }
 0x2ae   : > { %v849_v23 = vpack.c.bf16 %v1252_v22, %v1251_v20  ;;  %v814_v24 = vpop.f32.mrb[15].mxu0  ;;  %1264 = vmatpush3.bf16.msra.mxu1 %v847_v63 }
 0x2af   : > { %v848_v25 = vpack.c.bf16 %v814_v24, %v811_v21 }
 0x2b1   : > { %1265 = vmatprep.subr.bf16.mxu1 %v848_v25 }
 0x2b2   : > { %1266 = vmatpush3.bf16.msra.mxu1 %v848_v25 }
 0x2b3   : > { %1267 = vmatprep.subr.bf16.mxu1 %v849_v23 }
 0x2b6   : > { %1268 = vmatpush3.bf16.msra.mxu1 %v849_v23 }
 0x2b9   : > { %1270 = vmatmul.mubr.msk.bf16.vlgmr.msra.gmra.mrb[0].mxu1 %vm1125_vm0, %v1398_v38  ;;  %vm1969_vm0 = vcmp.eq.s32.totalorder %v1515_v16, %v1481_v6  ;;  %v827_v6 = vld [vmem:[%s1945_s3 + $0x8] sm:$0xff]  ;;  %v830_v16 = vld [vmem:[%s1945_s3 + $0x20] sm:$0xff] }
 0x2ba   : > { %1273 = vmatprep.mubr.msk.bf16.mxu1 %vm1127_vm10, %v1398_v38  ;;  %vm1137_vm9 = vmpackc.low %vm1970_vm1, %vm1969_vm0  ;;  %vm963_vm10 = vcmask 64512  }
 0x2c1   : > { %1274 = vmatmul.mubr.msk.bf16.gmra.mrb[4].mxu1 %vm1129_vm7, %v1398_v38 }
 0x2c2   : > { %1277 = vmatprep.mubr.msk.bf16.mxu1 %vm1131_vm14, %v1398_v38 }
 0x2c9   : > { %1278 = vmatmul.mubr.msk.bf16.gmra.mrb[8].mxu1 %vm1133_vm6, %v1398_v38 }
 0x2ca   : > { %1281 = vmatprep.mubr.msk.bf16.mxu1 %vm1135_vm5, %v1398_v38 }
 0x2d1   : > { %1282 = vmatmul.mubr.msk.bf16.gmra.mrb[12].mxu1 %vm1137_vm9, %v1398_v38  ;;  %v837_v38 = vld [vmem:[%s1945_s3 + $0x58] sm:$0xff] }
 0x38c   : > { %v1271_v5 = vpop.f32.mrb[0].mxu1 }
 0x38d   : > { %v949_v8 = vadd.f32 %v1271_v5, %v828_v3  ;;  %v884_v9 = vpop.f32.mrb[1].mxu1 }
 0x38e   : > { %v947_v10 = vadd.f32 %v884_v9, %v826_v4  ;;  %v1272_v11 = vpop.f32.mrb[2].mxu1 }
 0x38f   : > { %966 = vst.msk [vmem:[%s1945_s3 + $0x10] sm:$0xff] %vm963_vm10, %v949_v8  ;;  %v950_v12 = vadd.f32 %v1272_v11, %v829_v7  ;;  %v887_v13 = vpop.f32.mrb[3].mxu1 }
 0x390   : > { %964 = vst.msk [vmem:[%s1945_s3] sm:$0xff] %vm963_vm10, %v947_v10  ;;  %v948_v14 = vadd.f32 %v887_v13, %v827_v6 }
 0x391   : > { %967 = vst.msk [vmem:[%s1945_s3 + $0x18] sm:$0xff] %vm963_vm10, %v950_v12 }
 0x392   : > { %965 = vst.msk [vmem:[%s1945_s3 + $0x8] sm:$0xff] %vm963_vm10, %v948_v14 }
 0x394   : > { %v1275_v17 = vpop.f32.mrb[4].mxu1 }
 0x395   : > { %v953_v27 = vadd.f32 %v1275_v17, %v832_v15  ;;  %v900_v28 = vpop.f32.mrb[5].mxu1 }
 0x396   : > { %v951_v30 = vadd.f32 %v900_v28, %v830_v16  ;;  %v1276_v31 = vpop.f32.mrb[6].mxu1 }
 0x397   : > { %970 = vst.msk [vmem:[%s1945_s3 + $0x30] sm:$0xff] %vm963_vm10, %v953_v27  ;;  %v954_v32 = vadd.f32 %v1276_v31, %v833_v26  ;;  %v903_v33 = vpop.f32.mrb[7].mxu1 }
 0x398   : > { %968 = vst.msk [vmem:[%s1945_s3 + $0x20] sm:$0xff] %vm963_vm10, %v951_v30  ;;  %v952_v34 = vadd.f32 %v903_v33, %v831_v29 }
 0x399   : > { %971 = vst.msk [vmem:[%s1945_s3 + $0x38] sm:$0xff] %vm963_vm10, %v954_v32 }
 0x39a   : > { %969 = vst.msk [vmem:[%s1945_s3 + $0x28] sm:$0xff] %vm963_vm10, %v952_v34 }
 0x39c   : > { %v1279_v37 = vpop.f32.mrb[8].mxu1 }
 0x39d   : > { %v957_v39 = vadd.f32 %v1279_v37, %v836_v35  ;;  %v916_v40 = vpop.f32.mrb[9].mxu1 }
 0x39e   : > { %v955_v41 = vadd.f32 %v916_v40, %v834_v36  ;;  %v1280_v42 = vpop.f32.mrb[10].mxu1 }
 0x39f   : > { %974 = vst.msk [vmem:[%s1945_s3 + $0x50] sm:$0xff] %vm963_vm10, %v957_v39  ;;  %v958_v43 = vadd.f32 %v1280_v42, %v837_v38  ;;  %v919_v44 = vpop.f32.mrb[11].mxu1 }
 0x3a0   : > { %972 = vst.msk [vmem:[%s1945_s3 + $0x40] sm:$0xff] %vm963_vm10, %v955_v41  ;;  %v956_v45 = vadd.f32 %v919_v44, %v835_v0 }
 0x3a1   : > { %975 = vst.msk [vmem:[%s1945_s3 + $0x58] sm:$0xff] %vm963_vm10, %v958_v43 }
 0x3a2   : > { %973 = vst.msk [vmem:[%s1945_s3 + $0x48] sm:$0xff] %vm963_vm10, %v956_v45 }
 0x3a4   : > { %v1283_v48 = vpop.f32.mrb[12].mxu1 }
 0x3a5   : > { %v961_v50 = vadd.f32 %v1283_v48, %v840_v46  ;;  %v932_v51 = vpop.f32.mrb[13].mxu1 }
 0x3a6   : > { %v959_v53 = vadd.f32 %v932_v51, %v838_v47  ;;  %v1284_v54 = vpop.f32.mrb[14].mxu1 }
 0x3a7   : > { %978 = vst.msk [vmem:[%s1945_s3 + $0x70] sm:$0xff] %vm963_vm10, %v961_v50  ;;  %v962_v55 = vadd.f32 %v1284_v54, %v841_v49  ;;  %v935_v56 = vpop.f32.mrb[15].mxu1 }
 0x3a8   : > { %976 = vst.msk [vmem:[%s1945_s3 + $0x60] sm:$0xff] %vm963_vm10, %v959_v53  ;;  %v960_v57 = vadd.f32 %v935_v56, %v839_v52 }
 0x3a9   : > { %979 = vst.msk [vmem:[%s1945_s3 + $0x78] sm:$0xff] %vm963_vm10, %v962_v55 }
 0x3aa   : > { %977 = vst.msk [vmem:[%s1945_s3 + $0x68] sm:$0xff] %vm963_vm10, %v960_v57 }
 0x3ab PF: > { %s13_s16 = sadd.s32 1, %s1393_s16   ;;  %s1971_s12 = smov %s1385_s14 }
 0x3ac   : > { %p10_p1 = scmp.ge.s32.totalorder %s13_s16, 8   ;;  %s1972_s13 = smov %s1389_s15 }
 0x3ad   : > { %s1973_s14 = smov %s1976_s17  ;;  %s1974_s15 = smov %s1980_s18 }
 0x3ae   :  { %12 = sbr.rel (!%p10_p1) target bundleno = 3 (0x3), region = 80 }

</bundles_post_ra>
